<compile_context>
chip_gen: v7x
topology: tpu7x:2x2x1
jax: 0.10.0
libtpu: 0.0.40
codegen_flags: <defaults>
</compile_context>

<pallas_src>
import functools
import math

import jax
import jax.numpy as jnp
from jax.experimental import pallas as pl
from jax.experimental.pallas import tpu as pltpu

# ----------------------------- configuration --------------------------------
PADDING_IDX = 1
VOCAB = 100
NUM_LAYERS = 2
EMBED_DIM = 32          # C
FFN_DIM = 64            # ffn_embedding_dim
NUM_HEADS = 4
MAX_SEQ = 64
NUM_SEGMENTS = 2
NUM_BUCKETS = 32        # relative_attention_num_buckets
MAX_DISTANCE = 128
LN_EPS = 1e-5
NEG_MASK = -1e30        # finite "minus infinity"

B = 2
T = 8

# rows of the packed (L, 6, C) parameter-vector slab
_BO, _LN1_G, _LN1_B, _B2, _LN2_G, _LN2_B = range(6)


# ------------------------------ Pallas kernel --------------------------------
def _layer_norm(x, g, b):
    mu = jnp.mean(x, axis=-1, keepdims=True)
    xc = x - mu
    var = jnp.mean(xc * xc, axis=-1, keepdims=True)
    return xc * jax.lax.rsqrt(var + LN_EPS) * g + b


def _stack_kernel(x_ref, bm_ref, wqkv_ref, wo_ref, w1_ref, w2_ref,
                  bqkv_ref, b1_ref, vd_ref, o_ref, x_sc, ctx_sc,
                  *, num_heads, n_grp, grp_rows):
    """Whole encoder stack; one grid step == one post-norm transformer layer.

    x_sc keeps the fused (B*T, C) activations resident in VMEM across layers;
    ctx_sc assembles the per-head attention contexts into one (B*T, C) tile.
    """
    layer = pl.program_id(0)

    @pl.when(layer == 0)
    def _():
        x_sc[...] = x_ref[...]

    x = x_sc[...]                                   # (BT, C) f32
    rows, dim = x.shape
    head_dim = dim // num_heads

    def vrow(i):                                    # (1, C) row of the packed vector slab
        return vd_ref[0, i:i + 1, :]

    def mm(a, w_bf16):                              # bf16 MXU operands, f32 accumulation
        return jnp.dot(a.astype(jnp.bfloat16), w_bf16,
                       preferred_element_type=jnp.float32)

    # Fused QKV projection: one MXU push.  1/sqrt(head_dim) already folded into Wq/bq.
    qkv = mm(x, wqkv_ref[0]) + bqkv_ref[0]          # (BT, 3C) f32
    q = qkv[:, :dim]
    k = qkv[:, dim:2 * dim]
    v = qkv[:, 2 * dim:]

    # Multi-head attention.  Scores contract the last dims (MXU absorbs K-transpose);
    # per-head contexts land in ctx_sc so the output projection is a single matmul.
    for h in range(num_heads):
        lo, hi = h * head_dim, (h + 1) * head_dim
        s = jax.lax.dot_general(
            q[:, lo:hi].astype(jnp.bfloat16), k[:, lo:hi].astype(jnp.bfloat16),
            (((1,), (1,)), ((), ())), preferred_element_type=jnp.float32)  # (BT, BT)
        s = s + bm_ref[h]                           # rel-pos bias + batch-block / key-pad mask
        s = s - jnp.max(s, axis=-1, keepdims=True)
        p = jnp.exp(s)
        p = p * pl.reciprocal(jnp.sum(p, axis=-1, keepdims=True), approx=True)
        ctx_sc[:, lo:hi] = jnp.dot(p.astype(jnp.bfloat16),
                                   v[:, lo:hi].astype(jnp.bfloat16),
                                   preferred_element_type=jnp.float32)     # (BT, hd)
    attn = mm(ctx_sc[...], wo_ref[0]) + vrow(_BO)

    # residual + LayerNorm (post-norm), then FFN (relu), residual + LayerNorm (all f32).
    y = _layer_norm(x + attn, vrow(_LN1_G), vrow(_LN1_B))
    hid = jnp.maximum(mm(y, w1_ref[0]) + b1_ref[0], 0.0)
    ffn = mm(hid, w2_ref[0]) + vrow(_B2)
    out = _layer_norm(y + ffn, vrow(_LN2_G), vrow(_LN2_B))

    x_sc[...] = out        # carry activations to the next layer

    # Lane-dense per-layer store: pack n_grp row-groups of `out` side by side so the
    # emitted HBM slab has a 128-wide minor dim (the wrapper un-permutes).
    for g in range(n_grp):
        o_ref[0, :, g * dim:(g + 1) * dim] = out[g * grp_rows:(g + 1) * grp_rows, :]


def encoder_stack_pallas(x2d, biasmask, w_qkv, w_o, w1, w2, b_qkv, b1, vec_dim,
                         *, num_heads):
    """x2d: (B*T, C) f32.  Returns per-layer hidden states, shape (L, B*T, C)."""
    num_layers = w_qkv.shape[0]
    rows, dim = x2d.shape
    heads = biasmask.shape[0]
    ffn = w1.shape[-1]
    qkv_dim = w_qkv.shape[-1]

    lanes = 128
    if lanes % dim == 0 and rows % (lanes // dim) == 0:
        n_grp = lanes // dim            # lane-dense output packing
    else:
        n_grp = 1                       # fallback: plain (rows, dim) layout
    grp_rows = rows // n_grp

    kernel = functools.partial(_stack_kernel, num_heads=num_heads,
                               n_grp=n_grp, grp_rows=grp_rows)
    out = pl.pallas_call(
        kernel,
        grid=(num_layers,),
        in_specs=[
            pl.BlockSpec((rows, dim), lambda l: (0, 0)),             # x (fetched once)
            pl.BlockSpec((heads, rows, rows), lambda l: (0, 0, 0)),  # bias+mask (fetched once)
            pl.BlockSpec((1, dim, qkv_dim), lambda l: (l, 0, 0)),    # fused Wqkv (bf16)
            pl.BlockSpec((1, dim, dim), lambda l: (l, 0, 0)),        # Wo (bf16)
            pl.BlockSpec((1, dim, ffn), lambda l: (l, 0, 0)),        # fc1 weight (bf16)
            pl.BlockSpec((1, ffn, dim), lambda l: (l, 0, 0)),        # fc2 weight (bf16)
            pl.BlockSpec((1, 1, qkv_dim), lambda l: (l, 0, 0)),      # fused qkv bias (f32)
            pl.BlockSpec((1, 1, ffn), lambda l: (l, 0, 0)),          # fc1 bias (f32)
            pl.BlockSpec((1, 6, dim), lambda l: (l, 0, 0)),          # packed dim-width vectors
        ],
        out_specs=pl.BlockSpec((1, grp_rows, n_grp * dim), lambda l: (l, 0, 0)),
        out_shape=jax.ShapeDtypeStruct((num_layers, grp_rows, n_grp * dim), jnp.float32),
        scratch_shapes=[pltpu.VMEM((rows, dim), jnp.float32),   # resident activations
                        pltpu.VMEM((rows, dim), jnp.float32)],  # per-layer ctx assembly
        # The layer axis carries the resident activations -> must stay sequential.
        compiler_params=pltpu.CompilerParams(
            dimension_semantics=("arbitrary",),
            vmem_limit_bytes=32 * 1024 * 1024),
    )(x2d, biasmask, w_qkv, w_o, w1, w2, b_qkv, b1, vec_dim)

    # Undo the lane-dense packing: wide[l, i, g*dim + c] == state[l, g*grp_rows + i, c].
    states = out.reshape(num_layers, grp_rows, n_grp, dim)
    states = jnp.transpose(states, (0, 2, 1, 3)).reshape(num_layers, rows, dim)
    return states


# ------------------------------- JAX glue ------------------------------------
def relative_position_bucket(relative_position, num_buckets=32, max_distance=128):
    n = -relative_position
    num_buckets //= 2
    ret = (n < 0).astype(jnp.int32) * num_buckets
    n = jnp.abs(n)
    max_exact = num_buckets // 2
    is_small = n < max_exact
    n_safe = jnp.maximum(n, 1).astype(jnp.float32)
    val_if_large = max_exact + (
        jnp.log(n_safe / max_exact) / math.log(max_distance / max_exact)
        * (num_buckets - max_exact)).astype(jnp.int32)
    val_if_large = jnp.minimum(val_if_large, num_buckets - 1)
    return ret + jnp.where(is_small, n, val_if_large)


def _build_bias_and_mask(pos_bias, pad_mask):
    """(H, B*T, B*T) additive tensor for the batch-fused attention:
    block-diagonal relative-position bias, NEG_MASK across batches / at padded keys."""
    bsz, seq = pad_mask.shape
    rows = bsz * seq
    batch_of = jnp.arange(rows) // seq
    tpos = jnp.arange(rows) % seq
    same_batch = batch_of[:, None] == batch_of[None, :]
    key_ok = ~pad_mask.reshape(rows)
    allow = same_batch & key_ok[None, :]
    tiled = pos_bias[:, tpos[:, None], tpos[None, :]]            # (H, rows, rows)
    return jnp.where(allow[None], tiled, jnp.float32(NEG_MASK))


def _pack_layer_params(layers, num_heads):
    """Stack per-layer params: bf16 matmul weights, f32 bias/LN vectors.
    The 1/sqrt(head_dim) attention scaling is folded into Wq / bq here."""
    head_dim = EMBED_DIM // num_heads
    scaling = float(head_dim) ** -0.5
    w_qkv = jnp.stack([
        jnp.concatenate([lp["wq"] * scaling, lp["wk"], lp["wv"]], axis=1)
        for lp in layers]).astype(jnp.bfloat16)                              # (L, C, 3C)
    w_o = jnp.stack([lp["wo"] for lp in layers]).astype(jnp.bfloat16)        # (L, C, C)
    w1 = jnp.stack([lp["w1"] for lp in layers]).astype(jnp.bfloat16)         # (L, C, F)
    w2 = jnp.stack([lp["w2"] for lp in layers]).astype(jnp.bfloat16)         # (L, F, C)
    b_qkv = jnp.stack([
        jnp.concatenate([lp["bq"] * scaling, lp["bk"], lp["bv"]]).reshape(1, -1)
        for lp in layers])                                                   # (L, 1, 3C) f32
    b1 = jnp.stack([lp["b1"].reshape(1, -1) for lp in layers])               # (L, 1, F) f32
    vec_dim = jnp.stack([
        jnp.stack([lp["bo"], lp["ln1_g"], lp["ln1_b"],
                   lp["b2"], lp["ln2_g"], lp["ln2_b"]])
        for lp in layers])                                                   # (L, 6, C) f32
    return w_qkv, w_o, w1, w2, b_qkv, b1, vec_dim


def _embed_and_bias(params, tokens, segment_labels):
    """Token + learned positional (with padding offset) + segment embeddings, padding
    zero-out, and the shared relative-position bias (H, T, T)."""
    pad_mask = tokens == PADDING_IDX
    x = jnp.take(params["tok_emb"], tokens, axis=0)
    non_pad = (~pad_mask).astype(jnp.int32)
    positions = jnp.cumsum(non_pad, axis=1) * non_pad + PADDING_IDX
    x = x + jnp.take(params["pos_emb"], positions, axis=0)
    x = x + jnp.take(params["seg_emb"], segment_labels, axis=0)
    x = x * (1.0 - pad_mask.astype(x.dtype))[..., None]

    seq = tokens.shape[1]
    ctx = jnp.arange(seq)[:, None]
    mem = jnp.arange(seq)[None, :]
    rp_bucket = relative_position_bucket(mem - ctx, num_buckets=NUM_BUCKETS,
                                         max_distance=MAX_DISTANCE)
    pos_bias = jnp.transpose(jnp.take(params["rel_bias"], rp_bucket, axis=0), (2, 0, 1))
    return x, pos_bias, pad_mask


def transformer_sentence_encoder(params, tokens, segment_labels):
    x, pos_bias, pad_mask = _embed_and_bias(params, tokens, segment_labels)
    bsz, seq, dim = x.shape

    biasmask = _build_bias_and_mask(pos_bias, pad_mask)
    packed = _pack_layer_params(params["layers"], NUM_HEADS)

    states = encoder_stack_pallas(x.reshape(bsz * seq, dim), biasmask, *packed,
                                  num_heads=NUM_HEADS)               # (L, B*T, C)
    states = states.reshape(len(params["layers"]), bsz, seq, dim)

    inner_states = [jnp.transpose(x, (1, 0, 2))]   # fairseq keeps T x B x C states
    for i in range(states.shape[0]):
        inner_states.append(jnp.transpose(states[i], (1, 0, 2)))
    sentence_rep = states[-1][:, 0, :]
    return inner_states, sentence_rep


# ----------------------- pure-JAX f32 reference (for parity) ------------------
def _reference_forward(x, pos_bias, pad_mask, layers, num_heads):
    """Standard per-batch multi-head attention reference.  x: (B, T, C) f32."""
    bsz, seq, dim = x.shape
    hd = dim // num_heads
    scaling = float(hd) ** -0.5
    mask = jnp.where(pad_mask[:, None, None, :], jnp.float32(NEG_MASK), 0.0)

    def split(t):
        return t.reshape(bsz, seq, num_heads, hd).transpose(0, 2, 1, 3)

    states = []
    for lp in layers:
        q = (x @ lp["wq"] + lp["bq"]) * scaling
        k = x @ lp["wk"] + lp["bk"]
        v = x @ lp["wv"] + lp["bv"]
        s = jnp.einsum("bhqd,bhkd->bhqk", split(q), split(k)) + pos_bias[None] + mask
        p = jax.nn.softmax(s, axis=-1)
        ctx = jnp.einsum("bhqk,bhkd->bhqd", p, split(v))
        ctx = ctx.transpose(0, 2, 1, 3).reshape(bsz, seq, dim)
        attn = ctx @ lp["wo"] + lp["bo"]
        y = _layer_norm(x + attn, lp["ln1_g"], lp["ln1_b"])
        hid = jnp.maximum(y @ lp["w1"] + lp["b1"], 0.0)
        ffn = hid @ lp["w2"] + lp["b2"]
        x = _layer_norm(y + ffn, lp["ln2_g"], lp["ln2_b"])
        states.append(x)
    return states


def init_params(key):
    keys = jax.random.split(key, 4 + NUM_LAYERS)

    def normal(k, shape, std=0.02):
        return std * jax.random.normal(k, shape, dtype=jnp.float32)

    tok = normal(keys[0], (VOCAB, EMBED_DIM)).at[PADDING_IDX].set(0.0)
    pos = normal(keys[1], (MAX_SEQ + PADDING_IDX + 1, EMBED_DIM)).at[PADDING_IDX].set(0.0)
    seg = normal(keys[2], (NUM_SEGMENTS, EMBED_DIM))
    rel = normal(keys[3], (NUM_BUCKETS, NUM_HEADS))

    layers = []
    for i in range(NUM_LAYERS):
        lk = jax.random.split(keys[4 + i], 6)
        layers.append(dict(
            wq=normal(lk[0], (EMBED_DIM, EMBED_DIM)), bq=jnp.zeros((EMBED_DIM,), jnp.float32),
            wk=normal(lk[1], (EMBED_DIM, EMBED_DIM)), bk=jnp.zeros((EMBED_DIM,), jnp.float32),
            wv=normal(lk[2], (EMBED_DIM, EMBED_DIM)), bv=jnp.zeros((EMBED_DIM,), jnp.float32),
            wo=normal(lk[3], (EMBED_DIM, EMBED_DIM)), bo=jnp.zeros((EMBED_DIM,), jnp.float32),
            ln1_g=jnp.ones((EMBED_DIM,), jnp.float32), ln1_b=jnp.zeros((EMBED_DIM,), jnp.float32),
            w1=normal(lk[4], (EMBED_DIM, FFN_DIM)), b1=jnp.zeros((FFN_DIM,), jnp.float32),
            w2=normal(lk[5], (FFN_DIM, EMBED_DIM)), b2=jnp.zeros((EMBED_DIM,), jnp.float32),
            ln2_g=jnp.ones((EMBED_DIM,), jnp.float32), ln2_b=jnp.zeros((EMBED_DIM,), jnp.float32),
        ))
    return dict(tok_emb=tok, pos_emb=pos, seg_emb=seg, rel_bias=rel, layers=layers)


# --------------------------------- main ---------------------------------------
if __name__ == "__main__":
    key = jax.random.PRNGKey(0)
    pkey, tkey = jax.random.split(key)
    params = init_params(pkey)

    tokens = jax.random.randint(tkey, (B, T), 2, VOCAB, dtype=jnp.int32)
    tokens = tokens.at[1, T - 2:].set(PADDING_IDX)   # exercise the padding mask
    segment_labels = jnp.concatenate(
        [jnp.zeros((B, T // 2), jnp.int32), jnp.ones((B, T - T // 2), jnp.int32)],
        axis=1)

    encode = jax.jit(transformer_sentence_encoder)
    inner_states, sentence_rep = encode(params, tokens, segment_labels)
    jax.block_until_ready(sentence_rep)
    jax.block_until_ready(inner_states)

    assert sentence_rep.shape == (B, EMBED_DIM)
    assert len(inner_states) == NUM_LAYERS + 1
    assert all(s.shape == (T, B, EMBED_DIM) for s in inner_states)
    assert bool(jnp.all(jnp.isfinite(sentence_rep)))

    # Parity check vs pure-JAX f32 reference (loose tolerance: bf16 MXU operands and
    # approx-reciprocal softmax normalization in the kernel).
    x_emb, pos_bias, pad_mask = _embed_and_bias(params, tokens, segment_labels)
    ref_states = _reference_forward(x_emb, pos_bias, pad_mask, params["layers"], NUM_HEADS)
    for i, ref in enumerate(ref_states):
        got = jnp.transpose(inner_states[i + 1], (1, 0, 2))     # back to (B, T, C)
        err = float(jnp.max(jnp.abs(got - ref)))
        assert err < 5e-2, f"layer {i} mismatch vs reference: max abs err {err}"

    print("KERNEL_OK")
</pallas_src>

<mosaic_0001>
module attributes {stable_mosaic.version = 11 : i64} {
  func.func @_stack_kernel(%arg0: i32, %arg1: memref<16x32xf32, #tpu.memory_space<vmem>>, %arg2: memref<4x16x16xf32, #tpu.memory_space<vmem>>, %arg3: memref<1x32x96xbf16, #tpu.memory_space<vmem>>, %arg4: memref<1x32x32xbf16, #tpu.memory_space<vmem>>, %arg5: memref<1x32x64xbf16, #tpu.memory_space<vmem>>, %arg6: memref<1x64x32xbf16, #tpu.memory_space<vmem>>, %arg7: memref<1x1x96xf32, #tpu.memory_space<vmem>>, %arg8: memref<1x1x64xf32, #tpu.memory_space<vmem>>, %arg9: memref<1x6x32xf32, #tpu.memory_space<vmem>>, %arg10: memref<1x4x128xf32, #tpu.memory_space<vmem>>, %arg11: memref<16x32xf32, #tpu.memory_space<vmem>>, %arg12: memref<16x32xf32, #tpu.memory_space<vmem>>) attributes {dimension_semantics = [#tpu.dimension_semantics<arbitrary>], iteration_bounds = array<i64: 2>, scalar_prefetch = 0 : i64, scratch_operands = 2 : i64, tpu.core_type = #tpu.core_type<tc>, window_params = [{pipeline_mode = #tpu.pipeline_mode<synchronous>, transform_indices = @transform_0, window_bounds = array<i64: 16, 32>}, {pipeline_mode = #tpu.pipeline_mode<synchronous>, transform_indices = @transform_1, window_bounds = array<i64: 4, 16, 16>}, {transform_indices = @transform_2, window_bounds = array<i64: 1, 32, 96>}, {transform_indices = @transform_3, window_bounds = array<i64: 1, 32, 32>}, {transform_indices = @transform_4, window_bounds = array<i64: 1, 32, 64>}, {transform_indices = @transform_5, window_bounds = array<i64: 1, 64, 32>}, {transform_indices = @transform_6, window_bounds = array<i64: 1, 1, 96>}, {transform_indices = @transform_7, window_bounds = array<i64: 1, 1, 64>}, {transform_indices = @transform_8, window_bounds = array<i64: 1, 6, 32>}, {transform_indices = @transform_9, window_bounds = array<i64: 1, 4, 128>}]} {
    %c0_i32 = arith.constant 0 : i32
    %0 = arith.cmpi eq, %arg0, %c0_i32 : i32
    %1 = arith.extui %0 : i1 to i32
    %c0_i32_0 = arith.constant 0 : i32
    %2 = arith.cmpi ne, %1, %c0_i32_0 : i32
    scf.if %2 {
      %c0_93 = arith.constant 0 : index
      %c0_94 = arith.constant 0 : index
      %201 = vector.load %arg1[%c0_93, %c0_94] : memref<16x32xf32, #tpu.memory_space<vmem>>, vector<16x32xf32>
      %c0_95 = arith.constant 0 : index
      %c0_96 = arith.constant 0 : index
      %202 = vector.load %arg11[%c0_95, %c0_96] : memref<16x32xf32, #tpu.memory_space<vmem>>, vector<16x32xf32>
      tpu.vector_store %arg11[%c0_95, %c0_96], %201 {strides = array<i32>} : memref<16x32xf32, #tpu.memory_space<vmem>>, vector<16x32xf32>,
    } else {
    }
    %c0 = arith.constant 0 : index
    %c0_1 = arith.constant 0 : index
    %3 = vector.load %arg11[%c0, %c0_1] : memref<16x32xf32, #tpu.memory_space<vmem>>, vector<16x32xf32>
    %c0_2 = arith.constant 0 : index
    %c0_3 = arith.constant 0 : index
    %c0_4 = arith.constant 0 : index
    %4 = vector.load %arg3[%c0_2, %c0_3, %c0_4] : memref<1x32x96xbf16, #tpu.memory_space<vmem>>, vector<1x32x96xbf16>
    %5 = vector.shape_cast %4 : vector<1x32x96xbf16> to vector<32x96xbf16>
    %6 = arith.truncf %3 : vector<16x32xf32> to vector<16x32xbf16>
    %cst = arith.constant dense<0.000000e+00> : vector<16x96xf32>
    %7 = tpu.matmul %6, %5, %cst {dimension_numbers = #tpu.dot_dimension_numbers<[1], [0], [0], [1], [0, 0, 1, 1], [], []>} : vector<16x32xbf16>, vector<32x96xbf16>, vector<16x96xf32> -> vector<16x96xf32>
    %c0_5 = arith.constant 0 : index
    %c0_6 = arith.constant 0 : index
    %c0_7 = arith.constant 0 : index
    %8 = vector.load %arg7[%c0_5, %c0_6, %c0_7] : memref<1x1x96xf32, #tpu.memory_space<vmem>>, vector<1x1x96xf32>
    %9 = vector.shape_cast %8 : vector<1x1x96xf32> to vector<1x96xf32>
    %10 = vector.broadcast %9 : vector<1x96xf32> to vector<16x96xf32>
    %11 = arith.addf %7, %10 : vector<16x96xf32>
    %12 = vector.extract_strided_slice %11 {offsets = [0, 0], sizes = [16, 32], strides = [1, 1]} : vector<16x96xf32> to vector<16x32xf32>
    %13 = vector.extract_strided_slice %11 {offsets = [0, 32], sizes = [16, 32], strides = [1, 1]} : vector<16x96xf32> to vector<16x32xf32>
    %14 = vector.extract_strided_slice %11 {offsets = [0, 64], sizes = [16, 32], strides = [1, 1]} : vector<16x96xf32> to vector<16x32xf32>
    %15 = vector.extract_strided_slice %12 {offsets = [0, 0], sizes = [16, 8], strides = [1, 1]} : vector<16x32xf32> to vector<16x8xf32>
    %16 = arith.truncf %15 : vector<16x8xf32> to vector<16x8xbf16>
    %17 = vector.extract_strided_slice %13 {offsets = [0, 0], sizes = [16, 8], strides = [1, 1]} : vector<16x32xf32> to vector<16x8xf32>
    %18 = arith.truncf %17 : vector<16x8xf32> to vector<16x8xbf16>
    %cst_8 = arith.constant dense<0.000000e+00> : vector<16x16xf32>
    %19 = tpu.matmul %16, %18, %cst_8 {dimension_numbers = #tpu.dot_dimension_numbers<[1], [1], [0], [0], [0, 0, 1, 0], [], []>} : vector<16x8xbf16>, vector<16x8xbf16>, vector<16x16xf32> -> vector<16x16xf32>
    %c0_9 = arith.constant 0 : index
    %c0_10 = arith.constant 0 : index
    %c0_11 = arith.constant 0 : index
    %20 = vector.load %arg2[%c0_9, %c0_10, %c0_11] : memref<4x16x16xf32, #tpu.memory_space<vmem>>, vector<1x16x16xf32>
    %21 = vector.shape_cast %20 : vector<1x16x16xf32> to vector<16x16xf32>
    %22 = arith.addf %19, %21 : vector<16x16xf32>
    %cst_12 = arith.constant dense<0xFF800000> : vector<16xf32>
    %23 = vector.multi_reduction <maximumf>, %22, %cst_12 [1] : vector<16x16xf32> to vector<16xf32>
    %24 = vector.shape_cast %23 : vector<16xf32> to vector<16x1xf32>
    %25 = vector.broadcast %24 : vector<16x1xf32> to vector<16x16xf32>
    %26 = arith.subf %22, %25 : vector<16x16xf32>
    %27 = math.exp %26 : vector<16x16xf32>
    %cst_13 = arith.constant dense<0.000000e+00> : vector<16xf32>
    %28 = vector.multi_reduction <add>, %27, %cst_13 [1] : vector<16x16xf32> to vector<16xf32>
    %29 = vector.shape_cast %28 : vector<16xf32> to vector<16x1xf32>
    %30 = tpu.reciprocal %29 {approx = true} : vector<16x1xf32> -> vector<16x1xf32>
    %31 = vector.broadcast %30 : vector<16x1xf32> to vector<16x16xf32>
    %32 = arith.mulf %27, %31 : vector<16x16xf32>
    %33 = arith.truncf %32 : vector<16x16xf32> to vector<16x16xbf16>
    %34 = vector.extract_strided_slice %14 {offsets = [0, 0], sizes = [16, 8], strides = [1, 1]} : vector<16x32xf32> to vector<16x8xf32>
    %35 = arith.truncf %34 : vector<16x8xf32> to vector<16x8xbf16>
    %cst_14 = arith.constant dense<0.000000e+00> : vector<16x8xf32>
    %36 = tpu.matmul %33, %35, %cst_14 {dimension_numbers = #tpu.dot_dimension_numbers<[1], [0], [0], [1], [0, 0, 1, 1], [], []>} : vector<16x16xbf16>, vector<16x8xbf16>, vector<16x8xf32> -> vector<16x8xf32>
    %c0_15 = arith.constant 0 : index
    %c0_16 = arith.constant 0 : index
    %37 = vector.load %arg12[%c0_15, %c0_16] : memref<16x32xf32, #tpu.memory_space<vmem>>, vector<16x8xf32>
    tpu.vector_store %arg12[%c0_15, %c0_16], %36 {strides = array<i32>} : memref<16x32xf32, #tpu.memory_space<vmem>>, vector<16x8xf32>,
    %38 = vector.extract_strided_slice %12 {offsets = [0, 8], sizes = [16, 8], strides = [1, 1]} : vector<16x32xf32> to vector<16x8xf32>
    %39 = arith.truncf %38 : vector<16x8xf32> to vector<16x8xbf16>
    %40 = vector.extract_strided_slice %13 {offsets = [0, 8], sizes = [16, 8], strides = [1, 1]} : vector<16x32xf32> to vector<16x8xf32>
    %41 = arith.truncf %40 : vector<16x8xf32> to vector<16x8xbf16>
    %cst_17 = arith.constant dense<0.000000e+00> : vector<16x16xf32>
    %42 = tpu.matmul %39, %41, %cst_17 {dimension_numbers = #tpu.dot_dimension_numbers<[1], [1], [0], [0], [0, 0, 1, 0], [], []>} : vector<16x8xbf16>, vector<16x8xbf16>, vector<16x16xf32> -> vector<16x16xf32>
    %c1 = arith.constant 1 : index
    %c0_18 = arith.constant 0 : index
    %c0_19 = arith.constant 0 : index
    %43 = vector.load %arg2[%c1, %c0_18, %c0_19] : memref<4x16x16xf32, #tpu.memory_space<vmem>>, vector<1x16x16xf32>
    %44 = vector.shape_cast %43 : vector<1x16x16xf32> to vector<16x16xf32>
    %45 = arith.addf %42, %44 : vector<16x16xf32>
    %cst_20 = arith.constant dense<0xFF800000> : vector<16xf32>
    %46 = vector.multi_reduction <maximumf>, %45, %cst_20 [1] : vector<16x16xf32> to vector<16xf32>
    %47 = vector.shape_cast %46 : vector<16xf32> to vector<16x1xf32>
    %48 = vector.broadcast %47 : vector<16x1xf32> to vector<16x16xf32>
    %49 = arith.subf %45, %48 : vector<16x16xf32>
    %50 = math.exp %49 : vector<16x16xf32>
    %cst_21 = arith.constant dense<0.000000e+00> : vector<16xf32>
    %51 = vector.multi_reduction <add>, %50, %cst_21 [1] : vector<16x16xf32> to vector<16xf32>
    %52 = vector.shape_cast %51 : vector<16xf32> to vector<16x1xf32>
    %53 = tpu.reciprocal %52 {approx = true} : vector<16x1xf32> -> vector<16x1xf32>
    %54 = vector.broadcast %53 : vector<16x1xf32> to vector<16x16xf32>
    %55 = arith.mulf %50, %54 : vector<16x16xf32>
    %56 = arith.truncf %55 : vector<16x16xf32> to vector<16x16xbf16>
    %57 = vector.extract_strided_slice %14 {offsets = [0, 8], sizes = [16, 8], strides = [1, 1]} : vector<16x32xf32> to vector<16x8xf32>
    %58 = arith.truncf %57 : vector<16x8xf32> to vector<16x8xbf16>
    %cst_22 = arith.constant dense<0.000000e+00> : vector<16x8xf32>
    %59 = tpu.matmul %56, %58, %cst_22 {dimension_numbers = #tpu.dot_dimension_numbers<[1], [0], [0], [1], [0, 0, 1, 1], [], []>} : vector<16x16xbf16>, vector<16x8xbf16>, vector<16x8xf32> -> vector<16x8xf32>
    %c0_23 = arith.constant 0 : index
    %c8 = arith.constant 8 : index
    %60 = vector.load %arg12[%c0_23, %c8] : memref<16x32xf32, #tpu.memory_space<vmem>>, vector<16x8xf32>
    tpu.vector_store %arg12[%c0_23, %c8], %59 {strides = array<i32>} : memref<16x32xf32, #tpu.memory_space<vmem>>, vector<16x8xf32>,
    %61 = vector.extract_strided_slice %12 {offsets = [0, 16], sizes = [16, 8], strides = [1, 1]} : vector<16x32xf32> to vector<16x8xf32>
    %62 = arith.truncf %61 : vector<16x8xf32> to vector<16x8xbf16>
    %63 = vector.extract_strided_slice %13 {offsets = [0, 16], sizes = [16, 8], strides = [1, 1]} : vector<16x32xf32> to vector<16x8xf32>
    %64 = arith.truncf %63 : vector<16x8xf32> to vector<16x8xbf16>
    %cst_24 = arith.constant dense<0.000000e+00> : vector<16x16xf32>
    %65 = tpu.matmul %62, %64, %cst_24 {dimension_numbers = #tpu.dot_dimension_numbers<[1], [1], [0], [0], [0, 0, 1, 0], [], []>} : vector<16x8xbf16>, vector<16x8xbf16>, vector<16x16xf32> -> vector<16x16xf32>
    %c2 = arith.constant 2 : index
    %c0_25 = arith.constant 0 : index
    %c0_26 = arith.constant 0 : index
    %66 = vector.load %arg2[%c2, %c0_25, %c0_26] : memref<4x16x16xf32, #tpu.memory_space<vmem>>, vector<1x16x16xf32>
    %67 = vector.shape_cast %66 : vector<1x16x16xf32> to vector<16x16xf32>
    %68 = arith.addf %65, %67 : vector<16x16xf32>
    %cst_27 = arith.constant dense<0xFF800000> : vector<16xf32>
    %69 = vector.multi_reduction <maximumf>, %68, %cst_27 [1] : vector<16x16xf32> to vector<16xf32>
    %70 = vector.shape_cast %69 : vector<16xf32> to vector<16x1xf32>
    %71 = vector.broadcast %70 : vector<16x1xf32> to vector<16x16xf32>
    %72 = arith.subf %68, %71 : vector<16x16xf32>
    %73 = math.exp %72 : vector<16x16xf32>
    %cst_28 = arith.constant dense<0.000000e+00> : vector<16xf32>
    %74 = vector.multi_reduction <add>, %73, %cst_28 [1] : vector<16x16xf32> to vector<16xf32>
    %75 = vector.shape_cast %74 : vector<16xf32> to vector<16x1xf32>
    %76 = tpu.reciprocal %75 {approx = true} : vector<16x1xf32> -> vector<16x1xf32>
    %77 = vector.broadcast %76 : vector<16x1xf32> to vector<16x16xf32>
    %78 = arith.mulf %73, %77 : vector<16x16xf32>
    %79 = arith.truncf %78 : vector<16x16xf32> to vector<16x16xbf16>
    %80 = vector.extract_strided_slice %14 {offsets = [0, 16], sizes = [16, 8], strides = [1, 1]} : vector<16x32xf32> to vector<16x8xf32>
    %81 = arith.truncf %80 : vector<16x8xf32> to vector<16x8xbf16>
    %cst_29 = arith.constant dense<0.000000e+00> : vector<16x8xf32>
    %82 = tpu.matmul %79, %81, %cst_29 {dimension_numbers = #tpu.dot_dimension_numbers<[1], [0], [0], [1], [0, 0, 1, 1], [], []>} : vector<16x16xbf16>, vector<16x8xbf16>, vector<16x8xf32> -> vector<16x8xf32>
    %c0_30 = arith.constant 0 : index
    %c16 = arith.constant 16 : index
    %83 = vector.load %arg12[%c0_30, %c16] : memref<16x32xf32, #tpu.memory_space<vmem>>, vector<16x8xf32>
    tpu.vector_store %arg12[%c0_30, %c16], %82 {strides = array<i32>} : memref<16x32xf32, #tpu.memory_space<vmem>>, vector<16x8xf32>,
    %84 = vector.extract_strided_slice %12 {offsets = [0, 24], sizes = [16, 8], strides = [1, 1]} : vector<16x32xf32> to vector<16x8xf32>
    %85 = arith.truncf %84 : vector<16x8xf32> to vector<16x8xbf16>
    %86 = vector.extract_strided_slice %13 {offsets = [0, 24], sizes = [16, 8], strides = [1, 1]} : vector<16x32xf32> to vector<16x8xf32>
    %87 = arith.truncf %86 : vector<16x8xf32> to vector<16x8xbf16>
    %cst_31 = arith.constant dense<0.000000e+00> : vector<16x16xf32>
    %88 = tpu.matmul %85, %87, %cst_31 {dimension_numbers = #tpu.dot_dimension_numbers<[1], [1], [0], [0], [0, 0, 1, 0], [], []>} : vector<16x8xbf16>, vector<16x8xbf16>, vector<16x16xf32> -> vector<16x16xf32>
    %c3 = arith.constant 3 : index
    %c0_32 = arith.constant 0 : index
    %c0_33 = arith.constant 0 : index
    %89 = vector.load %arg2[%c3, %c0_32, %c0_33] : memref<4x16x16xf32, #tpu.memory_space<vmem>>, vector<1x16x16xf32>
    %90 = vector.shape_cast %89 : vector<1x16x16xf32> to vector<16x16xf32>
    %91 = arith.addf %88, %90 : vector<16x16xf32>
    %cst_34 = arith.constant dense<0xFF800000> : vector<16xf32>
    %92 = vector.multi_reduction <maximumf>, %91, %cst_34 [1] : vector<16x16xf32> to vector<16xf32>
    %93 = vector.shape_cast %92 : vector<16xf32> to vector<16x1xf32>
    %94 = vector.broadcast %93 : vector<16x1xf32> to vector<16x16xf32>
    %95 = arith.subf %91, %94 : vector<16x16xf32>
    %96 = math.exp %95 : vector<16x16xf32>
    %cst_35 = arith.constant dense<0.000000e+00> : vector<16xf32>
    %97 = vector.multi_reduction <add>, %96, %cst_35 [1] : vector<16x16xf32> to vector<16xf32>
    %98 = vector.shape_cast %97 : vector<16xf32> to vector<16x1xf32>
    %99 = tpu.reciprocal %98 {approx = true} : vector<16x1xf32> -> vector<16x1xf32>
    %100 = vector.broadcast %99 : vector<16x1xf32> to vector<16x16xf32>
    %101 = arith.mulf %96, %100 : vector<16x16xf32>
    %102 = arith.truncf %101 : vector<16x16xf32> to vector<16x16xbf16>
    %103 = vector.extract_strided_slice %14 {offsets = [0, 24], sizes = [16, 8], strides = [1, 1]} : vector<16x32xf32> to vector<16x8xf32>
    %104 = arith.truncf %103 : vector<16x8xf32> to vector<16x8xbf16>
    %cst_36 = arith.constant dense<0.000000e+00> : vector<16x8xf32>
    %105 = tpu.matmul %102, %104, %cst_36 {dimension_numbers = #tpu.dot_dimension_numbers<[1], [0], [0], [1], [0, 0, 1, 1], [], []>} : vector<16x16xbf16>, vector<16x8xbf16>, vector<16x8xf32> -> vector<16x8xf32>
    %c0_37 = arith.constant 0 : index
    %c24 = arith.constant 24 : index
    %106 = vector.load %arg12[%c0_37, %c24] : memref<16x32xf32, #tpu.memory_space<vmem>>, vector<16x8xf32>
    tpu.vector_store %arg12[%c0_37, %c24], %105 {strides = array<i32>} : memref<16x32xf32, #tpu.memory_space<vmem>>, vector<16x8xf32>,
    %c0_38 = arith.constant 0 : index
    %c0_39 = arith.constant 0 : index
    %107 = vector.load %arg12[%c0_38, %c0_39] : memref<16x32xf32, #tpu.memory_space<vmem>>, vector<16x32xf32>
    %c0_40 = arith.constant 0 : index
    %c0_41 = arith.constant 0 : index
    %c0_42 = arith.constant 0 : index
    %108 = vector.load %arg4[%c0_40, %c0_41, %c0_42] : memref<1x32x32xbf16, #tpu.memory_space<vmem>>, vector<1x32x32xbf16>
    %109 = vector.shape_cast %108 : vector<1x32x32xbf16> to vector<32x32xbf16>
    %110 = arith.truncf %107 : vector<16x32xf32> to vector<16x32xbf16>
    %cst_43 = arith.constant dense<0.000000e+00> : vector<16x32xf32>
    %111 = tpu.matmul %110, %109, %cst_43 {dimension_numbers = #tpu.dot_dimension_numbers<[1], [0], [0], [1], [0, 0, 1, 1], [], []>} : vector<16x32xbf16>, vector<32x32xbf16>, vector<16x32xf32> -> vector<16x32xf32>
    %c0_44 = arith.constant 0 : index
    %c0_45 = arith.constant 0 : index
    %c0_46 = arith.constant 0 : index
    %112 = vector.load %arg9[%c0_44, %c0_45, %c0_46] : memref<1x6x32xf32, #tpu.memory_space<vmem>>, vector<1x1x32xf32>
    %113 = vector.shape_cast %112 : vector<1x1x32xf32> to vector<1x32xf32>
    %114 = vector.broadcast %113 : vector<1x32xf32> to vector<16x32xf32>
    %115 = arith.addf %111, %114 : vector<16x32xf32>
    %116 = arith.addf %3, %115 : vector<16x32xf32>
    %c0_47 = arith.constant 0 : index
    %c1_48 = arith.constant 1 : index
    %c0_49 = arith.constant 0 : index
    %117 = vector.load %arg9[%c0_47, %c1_48, %c0_49] : memref<1x6x32xf32, #tpu.memory_space<vmem>>, vector<1x1x32xf32>
    %118 = vector.shape_cast %117 : vector<1x1x32xf32> to vector<1x32xf32>
    %c0_50 = arith.constant 0 : index
    %c2_51 = arith.constant 2 : index
    %c0_52 = arith.constant 0 : index
    %119 = vector.load %arg9[%c0_50, %c2_51, %c0_52] : memref<1x6x32xf32, #tpu.memory_space<vmem>>, vector<1x1x32xf32>
    %120 = vector.shape_cast %119 : vector<1x1x32xf32> to vector<1x32xf32>
    %cst_53 = arith.constant dense<0.000000e+00> : vector<16xf32>
    %121 = vector.multi_reduction <add>, %116, %cst_53 [1] : vector<16x32xf32> to vector<16xf32>
    %122 = vector.shape_cast %121 : vector<16xf32> to vector<16x1xf32>
    %cst_54 = arith.constant 3.200000e+01 : f32
    %123 = vector.broadcast %cst_54 : f32 to vector<16x1xf32>
    %124 = arith.divf %122, %123 : vector<16x1xf32>
    %125 = vector.broadcast %124 : vector<16x1xf32> to vector<16x32xf32>
    %126 = arith.subf %116, %125 : vector<16x32xf32>
    %127 = arith.mulf %126, %126 : vector<16x32xf32>
    %cst_55 = arith.constant dense<0.000000e+00> : vector<16xf32>
    %128 = vector.multi_reduction <add>, %127, %cst_55 [1] : vector<16x32xf32> to vector<16xf32>
    %129 = vector.shape_cast %128 : vector<16xf32> to vector<16x1xf32>
    %cst_56 = arith.constant 3.200000e+01 : f32
    %130 = vector.broadcast %cst_56 : f32 to vector<16x1xf32>
    %131 = arith.divf %129, %130 : vector<16x1xf32>
    %cst_57 = arith.constant 9.99999974E-6 : f32
    %132 = vector.broadcast %cst_57 : f32 to vector<16x1xf32>
    %133 = arith.addf %131, %132 : vector<16x1xf32>
    %134 = math.rsqrt %133 : vector<16x1xf32>
    %135 = vector.broadcast %134 : vector<16x1xf32> to vector<16x32xf32>
    %136 = arith.mulf %126, %135 : vector<16x32xf32>
    %137 = vector.broadcast %118 : vector<1x32xf32> to vector<16x32xf32>
    %138 = arith.mulf %136, %137 : vector<16x32xf32>
    %139 = vector.broadcast %120 : vector<1x32xf32> to vector<16x32xf32>
    %140 = arith.addf %138, %139 : vector<16x32xf32>
    %c0_58 = arith.constant 0 : index
    %c0_59 = arith.constant 0 : index
    %c0_60 = arith.constant 0 : index
    %141 = vector.load %arg5[%c0_58, %c0_59, %c0_60] : memref<1x32x64xbf16, #tpu.memory_space<vmem>>, vector<1x32x64xbf16>
    %142 = vector.shape_cast %141 : vector<1x32x64xbf16> to vector<32x64xbf16>
    %143 = arith.truncf %140 : vector<16x32xf32> to vector<16x32xbf16>
    %cst_61 = arith.constant dense<0.000000e+00> : vector<16x64xf32>
    %144 = tpu.matmul %143, %142, %cst_61 {dimension_numbers = #tpu.dot_dimension_numbers<[1], [0], [0], [1], [0, 0, 1, 1], [], []>} : vector<16x32xbf16>, vector<32x64xbf16>, vector<16x64xf32> -> vector<16x64xf32>
    %c0_62 = arith.constant 0 : index
    %c0_63 = arith.constant 0 : index
    %c0_64 = arith.constant 0 : index
    %145 = vector.load %arg8[%c0_62, %c0_63, %c0_64] : memref<1x1x64xf32, #tpu.memory_space<vmem>>, vector<1x1x64xf32>
    %146 = vector.shape_cast %145 : vector<1x1x64xf32> to vector<1x64xf32>
    %147 = vector.broadcast %146 : vector<1x64xf32> to vector<16x64xf32>
    %148 = arith.addf %144, %147 : vector<16x64xf32>
    %cst_65 = arith.constant 0.000000e+00 : f32
    %149 = vector.broadcast %cst_65 : f32 to vector<16x64xf32>
    %150 = arith.maximumf %148, %149 : vector<16x64xf32>
    %c0_66 = arith.constant 0 : index
    %c0_67 = arith.constant 0 : index
    %c0_68 = arith.constant 0 : index
    %151 = vector.load %arg6[%c0_66, %c0_67, %c0_68] : memref<1x64x32xbf16, #tpu.memory_space<vmem>>, vector<1x64x32xbf16>
    %152 = vector.shape_cast %151 : vector<1x64x32xbf16> to vector<64x32xbf16>
    %153 = arith.truncf %150 : vector<16x64xf32> to vector<16x64xbf16>
    %cst_69 = arith.constant dense<0.000000e+00> : vector<16x32xf32>
    %154 = tpu.matmul %153, %152, %cst_69 {dimension_numbers = #tpu.dot_dimension_numbers<[1], [0], [0], [1], [0, 0, 1, 1], [], []>} : vector<16x64xbf16>, vector<64x32xbf16>, vector<16x32xf32> -> vector<16x32xf32>
    %c0_70 = arith.constant 0 : index
    %c3_71 = arith.constant 3 : index
    %c0_72 = arith.constant 0 : index
    %155 = vector.load %arg9[%c0_70, %c3_71, %c0_72] : memref<1x6x32xf32, #tpu.memory_space<vmem>>, vector<1x1x32xf32>
    %156 = vector.shape_cast %155 : vector<1x1x32xf32> to vector<1x32xf32>
    %157 = vector.broadcast %156 : vector<1x32xf32> to vector<16x32xf32>
    %158 = arith.addf %154, %157 : vector<16x32xf32>
    %159 = arith.addf %140, %158 : vector<16x32xf32>
    %c0_73 = arith.constant 0 : index
    %c4 = arith.constant 4 : index
    %c0_74 = arith.constant 0 : index
    %160 = vector.load %arg9[%c0_73, %c4, %c0_74] : memref<1x6x32xf32, #tpu.memory_space<vmem>>, vector<1x1x32xf32>
    %161 = vector.shape_cast %160 : vector<1x1x32xf32> to vector<1x32xf32>
    %c0_75 = arith.constant 0 : index
    %c5 = arith.constant 5 : index
    %c0_76 = arith.constant 0 : index
    %162 = vector.load %arg9[%c0_75, %c5, %c0_76] : memref<1x6x32xf32, #tpu.memory_space<vmem>>, vector<1x1x32xf32>
    %163 = vector.shape_cast %162 : vector<1x1x32xf32> to vector<1x32xf32>
    %cst_77 = arith.constant dense<0.000000e+00> : vector<16xf32>
    %164 = vector.multi_reduction <add>, %159, %cst_77 [1] : vector<16x32xf32> to vector<16xf32>
    %165 = vector.shape_cast %164 : vector<16xf32> to vector<16x1xf32>
    %cst_78 = arith.constant 3.200000e+01 : f32
    %166 = vector.broadcast %cst_78 : f32 to vector<16x1xf32>
    %167 = arith.divf %165, %166 : vector<16x1xf32>
    %168 = vector.broadcast %167 : vector<16x1xf32> to vector<16x32xf32>
    %169 = arith.subf %159, %168 : vector<16x32xf32>
    %170 = arith.mulf %169, %169 : vector<16x32xf32>
    %cst_79 = arith.constant dense<0.000000e+00> : vector<16xf32>
    %171 = vector.multi_reduction <add>, %170, %cst_79 [1] : vector<16x32xf32> to vector<16xf32>
    %172 = vector.shape_cast %171 : vector<16xf32> to vector<16x1xf32>
    %cst_80 = arith.constant 3.200000e+01 : f32
    %173 = vector.broadcast %cst_80 : f32 to vector<16x1xf32>
    %174 = arith.divf %172, %173 : vector<16x1xf32>
    %cst_81 = arith.constant 9.99999974E-6 : f32
    %175 = vector.broadcast %cst_81 : f32 to vector<16x1xf32>
    %176 = arith.addf %174, %175 : vector<16x1xf32>
    %177 = math.rsqrt %176 : vector<16x1xf32>
    %178 = vector.broadcast %177 : vector<16x1xf32> to vector<16x32xf32>
    %179 = arith.mulf %169, %178 : vector<16x32xf32>
    %180 = vector.broadcast %161 : vector<1x32xf32> to vector<16x32xf32>
    %181 = arith.mulf %179, %180 : vector<16x32xf32>
    %182 = vector.broadcast %163 : vector<1x32xf32> to vector<16x32xf32>
    %183 = arith.addf %181, %182 : vector<16x32xf32>
    %c0_82 = arith.constant 0 : index
    %c0_83 = arith.constant 0 : index
    %184 = vector.load %arg11[%c0_82, %c0_83] : memref<16x32xf32, #tpu.memory_space<vmem>>, vector<16x32xf32>
    tpu.vector_store %arg11[%c0_82, %c0_83], %183 {strides = array<i32>} : memref<16x32xf32, #tpu.memory_space<vmem>>, vector<16x32xf32>,
    %185 = vector.extract_strided_slice %183 {offsets = [0, 0], sizes = [4, 32], strides = [1, 1]} : vector<16x32xf32> to vector<4x32xf32>
    %c0_84 = arith.constant 0 : index
    %c0_85 = arith.constant 0 : index
    %c0_86 = arith.constant 0 : index
    %186 = vector.load %arg10[%c0_84, %c0_85, %c0_86] : memref<1x4x128xf32, #tpu.memory_space<vmem>>, vector<1x4x32xf32>
    %187 = vector.shape_cast %186 : vector<1x4x32xf32> to vector<4x32xf32>
    %188 = vector.shape_cast %185 : vector<4x32xf32> to vector<1x4x32xf32>
    tpu.vector_store %arg10[%c0_84, %c0_85, %c0_86], %188 {strides = array<i32>} : memref<1x4x128xf32, #tpu.memory_space<vmem>>, vector<1x4x32xf32>,
    %189 = vector.extract_strided_slice %183 {offsets = [4, 0], sizes = [4, 32], strides = [1, 1]} : vector<16x32xf32> to vector<4x32xf32>
    %c0_87 = arith.constant 0 : index
    %c0_88 = arith.constant 0 : index
    %c32 = arith.constant 32 : index
    %190 = vector.load %arg10[%c0_87, %c0_88, %c32] : memref<1x4x128xf32, #tpu.memory_space<vmem>>, vector<1x4x32xf32>
    %191 = vector.shape_cast %190 : vector<1x4x32xf32> to vector<4x32xf32>
    %192 = vector.shape_cast %189 : vector<4x32xf32> to vector<1x4x32xf32>
    tpu.vector_store %arg10[%c0_87, %c0_88, %c32], %192 {strides = array<i32>} : memref<1x4x128xf32, #tpu.memory_space<vmem>>, vector<1x4x32xf32>,
    %193 = vector.extract_strided_slice %183 {offsets = [8, 0], sizes = [4, 32], strides = [1, 1]} : vector<16x32xf32> to vector<4x32xf32>
    %c0_89 = arith.constant 0 : index
    %c0_90 = arith.constant 0 : index
    %c64 = arith.constant 64 : index
    %194 = vector.load %arg10[%c0_89, %c0_90, %c64] : memref<1x4x128xf32, #tpu.memory_space<vmem>>, vector<1x4x32xf32>
    %195 = vector.shape_cast %194 : vector<1x4x32xf32> to vector<4x32xf32>
    %196 = vector.shape_cast %193 : vector<4x32xf32> to vector<1x4x32xf32>
    tpu.vector_store %arg10[%c0_89, %c0_90, %c64], %196 {strides = array<i32>} : memref<1x4x128xf32, #tpu.memory_space<vmem>>, vector<1x4x32xf32>,
    %197 = vector.extract_strided_slice %183 {offsets = [12, 0], sizes = [4, 32], strides = [1, 1]} : vector<16x32xf32> to vector<4x32xf32>
    %c0_91 = arith.constant 0 : index
    %c0_92 = arith.constant 0 : index
    %c96 = arith.constant 96 : index
    %198 = vector.load %arg10[%c0_91, %c0_92, %c96] : memref<1x4x128xf32, #tpu.memory_space<vmem>>, vector<1x4x32xf32>
    %199 = vector.shape_cast %198 : vector<1x4x32xf32> to vector<4x32xf32>
    %200 = vector.shape_cast %197 : vector<4x32xf32> to vector<1x4x32xf32>
    tpu.vector_store %arg10[%c0_91, %c0_92, %c96], %200 {strides = array<i32>} : memref<1x4x128xf32, #tpu.memory_space<vmem>>, vector<1x4x32xf32>,
    return
  }
  func.func @transform_0(%arg0: i32) -> (i32, i32) {
    %c0_i32 = arith.constant 0 : i32
    %c0_i32_0 = arith.constant 0 : i32
    %c0_i32_1 = arith.constant 0 : i32
    return %c0_i32, %c0_i32_0 : i32, i32
  }
  func.func @transform_1(%arg0: i32) -> (i32, i32, i32) {
    %c0_i32 = arith.constant 0 : i32
    %c0_i32_0 = arith.constant 0 : i32
    %c0_i32_1 = arith.constant 0 : i32
    %c0_i32_2 = arith.constant 0 : i32
    return %c0_i32, %c0_i32_0, %c0_i32_1 : i32, i32, i32
  }
  func.func @transform_2(%arg0: i32) -> (i32, i32, i32) {
    %c0_i32 = arith.constant 0 : i32
    %c0_i32_0 = arith.constant 0 : i32
    %c0_i32_1 = arith.constant 0 : i32
    return %arg0, %c0_i32, %c0_i32_0 : i32, i32, i32
  }
  func.func @transform_3(%arg0: i32) -> (i32, i32, i32) {
    %c0_i32 = arith.constant 0 : i32
    %c0_i32_0 = arith.constant 0 : i32
    %c0_i32_1 = arith.constant 0 : i32
    return %arg0, %c0_i32, %c0_i32_0 : i32, i32, i32
  }
  func.func @transform_4(%arg0: i32) -> (i32, i32, i32) {
    %c0_i32 = arith.constant 0 : i32
    %c0_i32_0 = arith.constant 0 : i32
    %c0_i32_1 = arith.constant 0 : i32
    return %arg0, %c0_i32, %c0_i32_0 : i32, i32, i32
  }
  func.func @transform_5(%arg0: i32) -> (i32, i32, i32) {
    %c0_i32 = arith.constant 0 : i32
    %c0_i32_0 = arith.constant 0 : i32
    %c0_i32_1 = arith.constant 0 : i32
    return %arg0, %c0_i32, %c0_i32_0 : i32, i32, i32
  }
  func.func @transform_6(%arg0: i32) -> (i32, i32, i32) {
    %c0_i32 = arith.constant 0 : i32
    %c0_i32_0 = arith.constant 0 : i32
    %c0_i32_1 = arith.constant 0 : i32
    return %arg0, %c0_i32, %c0_i32_0 : i32, i32, i32
  }
  func.func @transform_7(%arg0: i32) -> (i32, i32, i32) {
    %c0_i32 = arith.constant 0 : i32
    %c0_i32_0 = arith.constant 0 : i32
    %c0_i32_1 = arith.constant 0 : i32
    return %arg0, %c0_i32, %c0_i32_0 : i32, i32, i32
  }
  func.func @transform_8(%arg0: i32) -> (i32, i32, i32) {
    %c0_i32 = arith.constant 0 : i32
    %c0_i32_0 = arith.constant 0 : i32
    %c0_i32_1 = arith.constant 0 : i32
    return %arg0, %c0_i32, %c0_i32_0 : i32, i32, i32
  }
  func.func @transform_9(%arg0: i32) -> (i32, i32, i32) {
    %c0_i32 = arith.constant 0 : i32
    %c0_i32_0 = arith.constant 0 : i32
    %c0_i32_1 = arith.constant 0 : i32
    return %arg0, %c0_i32, %c0_i32_0 : i32, i32, i32
  }
}

</mosaic_0001>

<bundles_post_ra>
// kernel: transformer_sentence_encoder.1
= control target key start
LH: loop header
LB: loop body
LE: loop exit
PB: predicated region body
PF: predicated region fallthrough
CT: control target
= control target key end

     0   :  { %s1817_s30 = smov 0   ;;  %s2047_s0 = inlined_call_operand.vmem [shape: f32[16,32], index: 0, kind: input, shape index: {}]   ;;  %s2048_s1 = inlined_call_operand.vmem [shape: f32[4,16,16], index: 1, kind: input, shape index: {}]   ;;  %s2049_s2 = inlined_call_operand.vmem [shape: bf16[2,32,96], index: 2, kind: input, shape index: {}]   ;;  %s2050_s3 = inlined_call_operand.vmem [shape: bf16[2,32,32], index: 3, kind: input, shape index: {}]   ;;  %s2051_s4 = inlined_call_operand.vmem [shape: bf16[2,32,64], index: 4, kind: input, shape index: {}]   ;;  %s2052_s5 = inlined_call_operand.vmem [shape: bf16[2,64,32], index: 5, kind: input, shape index: {}]   ;;  %s2053_s6 = inlined_call_operand.vmem [shape: f32[2,1,96], index: 6, kind: input, shape index: {}]   ;;  %s2054_s7 = inlined_call_operand.vmem [shape: f32[2,1,64], index: 7, kind: input, shape index: {}]   ;;  %s2055_s8 = inlined_call_operand.vmem [shape: f32[2,6,32], index: 8, kind: input, shape index: {}]   ;;  %s2056_s9 = inlined_call_operand.vmem [shape: f32[2,4,128], index: 9, kind: output, shape index: {}]  }
   0x1   :  { %2057 = sst [smem:[#allocation4_spill]] %s2049_s2 }
   0x2   :  { %2058 = sst [smem:[#allocation5_spill]] %s2050_s3 }
   0x3 LB: > { %s1495_s10 = sadd.s32 4294967295, %s1748_s30   ;;  %p1499_p0 = scmp.ge.s32.totalorder %s1748_s30, 1  ;;  %s1748_s30 = sphi %s1817_s30, %s19_s30  }
   0x4   : > { %p342_p1 = scmp.lt.s32.totalorder %s1748_s30, 3 }
   0x6   : > { %p343_p2 = pnand %p1499_p0, %p342_p1 }
   0x7   : > { %p402_p3 = scmp.lt.s32.totalorder (!%p343_p2), %s1495_s10, 1  ;;  %s2059_s2 = sld [smem:[#allocation4_spill]] (!%p343_p2) }
   0x8   : > { %346 = sbr.rel (%p343_p2) target bundleno = 2717 (0xa9d), region = 56  ;;  %s2060_s3 = sld [smem:[#allocation5_spill]] (!%p343_p2) }
   0x9   : > { %p1510_p4 = scmp.ne.s32.totalorder (!%p343_p2), %s1495_s10, 0 }
   0xf   : > { %s1825_s11 = scalar_select %p402_p3, %s1495_s10, 1 }
  0x10   : > { %440 = sbr.rel (%p1510_p4) target bundleno = 23 (0x17), region = 60  ;;  %v441_v0 = vld [vmem:[%s2047_s0] sm:$0xff] (!%p1510_p4)  ;;  %vm443_vm0 = vcmask (!%p1510_p4), 261120   ;;  %v442_v1 = vld [vmem:[%s2047_s0 + $0x8] sm:$0xff] (!%p1510_p4) }
  0x11   : > { %s1549_s12 = sshll.u32 %s1825_s11, 4  ;;  %s1552_s13 = sshll.u32 %s1825_s11, 5  ;;  %444 = vst.msk [vmem:[#allocation2] sm:$0xff] (!%p1510_p4), %vm443_vm0, %v441_v0  ;;  %445 = vst.msk [vmem:[#allocation2 + $0x8] sm:$0xff] (!%p1510_p4), %vm443_vm0, %v442_v1 }
  0x12   : > { %s406_s16 = scalar_lea.vmem %s2059_s2, %s1549_s12  ;;  %s1835_s19 = scalar_lea.vmem %s2060_s3, %s1549_s12 }
  0x13   : > { %s1840_s22 = scalar_lea.vmem %s2051_s4, %s1549_s12  ;;  %s1845_s25 = scalar_lea.vmem %s2052_s5, %s1552_s13 }
  0x14   : > { %s424_s28 = scalar_lea.vmem %s2053_s6, %s1825_s11  ;;  %s427_s15 = scalar_lea.vmem %s2054_s7, %s1825_s11 }
  0x15   : > { %s1508_s17 = sshll.u32 %s1825_s11, 3  ;;  %s1509_s18 = sshll.u32 %s1825_s11, 2 }
  0x16   : > { %s1860_s12 = scalar_lea.vmem %s2055_s8, %s1508_s17  ;;  %s1865_s13 = scalar_lea.vmem %s2056_s9, %s1509_s18 }
  0x17 PF: > { %v1692_v2 = vld [vmem:[%s406_s16] sm:$0xff]   ;;  %v1750_v3 = vmov 0.0   ;;  %v1693_v4 = vld [vmem:[%s406_s16 + $0x8] sm:$0xff]   ;;  %vm1751_vm1 = vmmov 0   ;;  %vm472_vm2 = vcmask 261120   ;;  %s1752_s10 = smov 120  }
  0x18   : > { %1583 = vmatprep.subr.bf16.mxu0 %v1750_v3  ;;  %1591 = vmatprep.subr.bf16.mxu1 %v1750_v3  ;;  %v1877_v5 = vld [vmem:[#allocation2] sm:$0xff]  ;;  %v1879_v6 = vld [vmem:[#allocation2 + $0x8] sm:$0xff]  ;;  %s1753_s16 = smov 96   ;;  %s1754_s29 = smov 80   ;;  %vm523_vm3 = vcmask 64512   ;;  %vm571_vm4 = vcmask 130048  }
  0x19   : > { %1584 = vmatpush3.bf16.msra.mxu0 %v1692_v2  ;;  %1587 = vmatprep.mubr.msk.bf16.mxu0 %vm1751_vm1, %v1750_v3  ;;  %v452_v7 = vpack.c.bf16 %v1879_v6, %v1877_v5  ;;  %v1511_v8 = vld [vmem:[%s424_s28] ss:$0 sm:$0xff]  ;;  %s1755_s14 = smov 88   ;;  %s1756_s28 = smov 72   ;;  %v519_v29 = vld [vmem:[%s2048_s1 + $0x8] sm:$0xff]  ;;  %v1517_v37 = vld [vmem:[%s2048_s1 + $0x10] sm:$0xff] }
  0x1a   : > { %1585 = vmatprep.subr.bf16.mxu0 %v1750_v3  ;;  %1593 = vmatprep.mubr.msk.bf16.mxu1 %vm1751_vm1, %v1750_v3  ;;  %s1757_s17 = smov 112   ;;  %s1758_s18 = smov 104   ;;  %v518_v27 = vld [vmem:[%s2048_s1] sm:$0xff]  ;;  %v1518_v39 = vld [vmem:[%s2048_s1 + $0x18] sm:$0xff]  ;;  %v1522_v49 = vld [vmem:[%s2048_s1 + $0x28] sm:$0xff]  ;;  %vm776_vm5 = vcmask 130112  }
  0x1b   : > { %v1521_v47 = vld [vmem:[%s2048_s1 + $0x20] sm:$0xff]  ;;  %v1525_v57 = vld [vmem:[%s2048_s1 + $0x30] sm:$0xff]  ;;  %v1526_v59 = vld [vmem:[%s2048_s1 + $0x38] sm:$0xff]  ;;  %s1759_s23 = smov 56   ;;  %s1760_s24 = smov 64   ;;  %vm911_vm6 = vcmask 195712  }
  0x1c   : > { %s1761_s26 = smov 48   ;;  %s1762_s27 = smov 40   ;;  %vm1046_vm7 = vcmask 261312   ;;  %vm1268_vm8 = vcmask 523264   ;;  %vm1357_vm9 = vcmask 257024   ;;  %vm1363_vm10 = vcmask 523524  }
  0x1d   : > { %1586 = vmatpush3.bf16.msra.mxu0 %v1693_v4  ;;  %s1763_s2 = smov 8   ;;  %s1764_s3 = smov 16   ;;  %vm1369_vm11 = vcmask 781824   ;;  %vm1374_vm12 = vcmask 1048324  }
  0x1e   : > { %1597 = vmatprep.subr.bf16.mxu0 %v1750_v3  ;;  %s1766_s11 = smov 32  }
  0x20   : > { %1588 = vmatmul.mubr.msk.bf16.vlgmr.msra.gmra.mrb[0].mxu0 %vm472_vm2, %v452_v7 }
  0x21   : > { %1599 = vmatprep.mubr.msk.bf16.mxu0 %vm1751_vm1, %v1750_v3 }
  0xf3   : > { %v510_v9 = vpop.f32.mrb[0].mxu0 }
  0xf4   : > { %v1589_v10 = vpop.f32.mrb[1].mxu0  ;;  %v511_v12 = vadd.f32 %v1511_v8, %v510_v9 }
  0xf5   : > { %v513_v11 = vpop.f32.mrb[2].mxu0 }
  0xf6   : > { %v514_v13 = vadd.f32 %v1511_v8, %v513_v11  ;;  %v1590_v14 = vpop.f32.mrb[3].mxu0 }
  0xf8   : > { %v1895_v15 = vpack.c.bf16 %v514_v13, %v511_v12 }
  0xfa   : > { %647 = vrot.lane.b32.xlu1 %v1895_v15, %s1752_s10  ;;  %521 = vrot.lane.b32.xlu0 %v1895_v15, %s1753_s16  ;;  %s1765_s10 = smov 24  }
  0xfe   : > { %784 = vrot.lane.b32.xlu1 %v1895_v15, %s1754_s29  ;;  %649 = vrot.lane.b32.xlu0 %v1895_v15, %s1755_s14 }
 0x102   : > { %919 = vrot.lane.b32.xlu1 %v1895_v15, %s1756_s28  ;;  %782 = vrot.lane.b32.xlu0 %v1895_v15, %s1757_s17 }
 0x106   : > { %917 = vrot.lane.b32.xlu0 %v1895_v15, %s1758_s18 }
 0x16c   : > { %v522_v16 = vpop.permute.xlu0 %521  ;;  %v648_v19 = vpop.permute.xlu1 %647 }
 0x16d   : > { %v528_v17 = vsel %vm523_vm3, %v522_v16, 0 }
 0x16e   : > { %1592 = vmatpush3.bf16.xpose.msra.mxu1 %v528_v17 }
 0x16f   : > { %1603 = vmatprep.subr.bf16.mxu1 %v1750_v3 }
 0x170   : > { %v650_v18 = vpop.permute.xlu0 %649  ;;  %v785_v21 = vpop.permute.xlu1 %784 }
 0x171   : > { %v655_v20 = vsel %vm523_vm3, %v650_v18, 0  ;;  %v790_v22 = vsel %vm523_vm3, %v785_v21, 0 }
 0x174   : > { %v920_v23 = vpop.permute.xlu1 %919  ;;  %v783_v24 = vpop.permute.xlu0 %782 }
 0x175   : > { %1594 = vmatmul.mubr.msk.bf16.vlgmr.msra.gmra.mrb[0].mxu1 %vm523_vm3, %v1895_v15  ;;  %v925_v25 = vsel %vm523_vm3, %v920_v23, 0 }
 0x176   : > { %1604 = vmatpush3.bf16.xpose.msra.mxu1 %v655_v20  ;;  %1605 = vmatprep.mubr.msk.bf16.mxu1 %vm1751_vm1, %v1750_v3 }
 0x177   : > { %1615 = vmatprep.subr.bf16.mxu1 %v1750_v3 }
 0x178   : > { %v918_v26 = vpop.permute.xlu0 %917 }
 0x17d   : > { %1606 = vmatmul.mubr.msk.bf16.vlgmr.msra.gmra.mrb[4].mxu1 %vm523_vm3, %v648_v19 }
 0x17e   : > { %1616 = vmatpush3.bf16.xpose.msra.mxu1 %v790_v22  ;;  %1617 = vmatprep.mubr.msk.bf16.mxu1 %vm1751_vm1, %v1750_v3 }
 0x17f   : > { %1627 = vmatprep.subr.bf16.mxu1 %v1750_v3 }
 0x185   : > { %1618 = vmatmul.mubr.msk.bf16.vlgmr.msra.gmra.mrb[8].mxu1 %vm523_vm3, %v783_v24 }
 0x186   : > { %1628 = vmatpush3.bf16.xpose.msra.mxu1 %v925_v25  ;;  %1629 = vmatprep.mubr.msk.bf16.mxu1 %vm1751_vm1, %v1750_v3 }
 0x187   : > { %1639 = vmatprep.subr.bf16.mxu1 %v1750_v3 }
 0x18d   : > { %1630 = vmatmul.mubr.msk.bf16.vlgmr.msra.gmra.mrb[12].mxu1 %vm523_vm3, %v918_v26 }
 0x18e   : > { %1643 = vmatprep.mubr.msk.bf16.mxu1 %vm1751_vm1, %v1750_v3 }
 0x248   : > { %v564_v28 = vpop.f32.mrb[0].mxu1 }
 0x249   : > { %v565_v30 = vadd.f32 %v564_v28, %v518_v27  ;;  %v1595_v31 = vpop.f32.mrb[1].mxu1 }
 0x24a   : > { %v567_v32 = vpop.f32.mrb[2].mxu1 }
 0x24b   : > { %v568_v33 = vadd.f32 %v567_v32, %v519_v29  ;;  %v1596_v34 = vpop.f32.mrb[3].mxu1  ;;  %v572_v35 = vsel %vm571_vm4, %v565_v30, -inf }
 0x24c   : > { %573 = vmax.xlane.f32.xlu1 %v572_v35 }
 0x24d   : > { %v575_v36 = vsel %vm571_vm4, %v568_v33, -inf }
 0x24e   : > { %576 = vmax.xlane.f32.xlu0 %v575_v36 }
 0x250   : > { %v691_v38 = vpop.f32.mrb[4].mxu1 }
 0x251   : > { %v692_v40 = vadd.f32 %v1517_v37, %v691_v38  ;;  %v1607_v41 = vpop.f32.mrb[5].mxu1 }
 0x252   : > { %v694_v42 = vpop.f32.mrb[6].mxu1 }
 0x253   : > { %v695_v43 = vadd.f32 %v1518_v39, %v694_v42  ;;  %v1608_v44 = vpop.f32.mrb[7].mxu1  ;;  %v698_v45 = vsel %vm571_vm4, %v692_v40, -inf }
 0x254   : > { %699 = vmax.xlane.f32.xlu0 %v698_v45 }
 0x255   : > { %v701_v46 = vsel %vm571_vm4, %v695_v43, -inf }
 0x256   : > { %702 = vmax.xlane.f32.xlu1 %v701_v46 }
 0x258   : > { %v826_v48 = vpop.f32.mrb[8].mxu1 }
 0x259   : > { %v827_v50 = vadd.f32 %v1521_v47, %v826_v48  ;;  %v1619_v51 = vpop.f32.mrb[9].mxu1 }
 0x25a   : > { %v829_v52 = vpop.f32.mrb[10].mxu1 }
 0x25b   : > { %v830_v53 = vadd.f32 %v1522_v49, %v829_v52  ;;  %v1620_v54 = vpop.f32.mrb[11].mxu1  ;;  %v833_v55 = vsel %vm571_vm4, %v827_v50, -inf }
 0x25c   : > { %834 = vmax.xlane.f32.xlu0 %v833_v55 }
 0x25d   : > { %v836_v56 = vsel %vm571_vm4, %v830_v53, -inf }
 0x25e   : > { %837 = vmax.xlane.f32.xlu1 %v836_v56 }
 0x260   : > { %v961_v58 = vpop.f32.mrb[12].mxu1 }
 0x261   : > { %v962_v60 = vadd.f32 %v1525_v57, %v961_v58  ;;  %v1631_v61 = vpop.f32.mrb[13].mxu1 }
 0x262   : > { %v964_v62 = vpop.f32.mrb[14].mxu1 }
 0x263   : > { %v965_v63 = vadd.f32 %v1526_v59, %v964_v62  ;;  %v1632_v0 = vpop.f32.mrb[15].mxu1  ;;  %v968_v1 = vsel %vm571_vm4, %v962_v60, -inf }
 0x264   : > { %969 = vmax.xlane.f32.xlu0 %v968_v1 }
 0x265   : > { %v971_v2 = vsel %vm571_vm4, %v965_v63, -inf }
 0x266   : > { %972 = vmax.xlane.f32.xlu1 %v971_v2 }
 0x2d9   : > { %v574_v4 = vpop.xlane.xlu1 %573 }
 0x2da   : > { %v578_v7 = vsub.f32 %v565_v30, %v574_v4 }
 0x2db   : > { %v577_v8 = vpop.xlane.xlu0 %576 }
 0x2dc   : > { %v580_v9 = vmul.f32 1.442695, %v578_v7  ;;  %v579_v10 = vsub.f32 %v568_v33, %v577_v8 }
 0x2de   : > { %1702 = vpow2.f32 %v580_v9  ;;  %v582_v11 = vmul.f32 1.442695, %v579_v10 }
 0x2e0   : > { %1704 = vpow2.f32 %v582_v11 }
 0x2e1   : > { %v700_v12 = vpop.xlane.xlu0 %699 }
 0x2e2   : > { %v704_v13 = vsub.f32 %v692_v40, %v700_v12 }
 0x2e3   : > { %v703_v22 = vpop.xlane.xlu1 %702 }
 0x2e4   : > { %v706_v14 = vmul.f32 1.442695, %v704_v13  ;;  %v705_v23 = vsub.f32 %v695_v43, %v703_v22 }
 0x2e6   : > { %1706 = vpow2.f32 %v706_v14  ;;  %v708_v26 = vmul.f32 1.442695, %v705_v23 }
 0x2e8   : > { %v1703_v16 = vpop.eup %1702  ;;  %1708 = vpow2.f32 %v708_v26  ;;  %v1694_v26 = vld [vmem:[%s1835_s19] sm:$0xff]  }
 0x2e9   : > { %v584_v17 = vsel %vm571_vm4, %v1703_v16, 0.0  ;;  %v835_v25 = vpop.xlane.xlu0 %834  ;;  %1640 = vmatpush3.bf16.msra.mxu1 %v1694_v26  ;;  %v1535_v26 = vld [vmem:[%s427_s15] ss:$0 sm:$0xff] }
 0x2ea   : > { %v1705_v18 = vpop.eup %1704  ;;  %585 = vadd.xlane.f32.xlu0 %v584_v17  ;;  %v839_v29 = vsub.f32 %v827_v50, %v835_v25  ;;  %1641 = vmatprep.subr.bf16.mxu1 %v1750_v3 }
 0x2eb   : > { %v587_v19 = vsel %vm571_vm4, %v1705_v18, 0.0  ;;  %v838_v24 = vpop.xlane.xlu1 %837 }
 0x2ec   : > { %588 = vadd.xlane.f32.xlu1 %v587_v19  ;;  %v840_v27 = vsub.f32 %v830_v53, %v838_v24  ;;  %v841_v33 = vmul.f32 1.442695, %v839_v29 }
 0x2ee   : > { %v843_v31 = vmul.f32 1.442695, %v840_v27 }
 0x2f0   : > { %v1960_v20 = vpop.eup %1706  ;;  %1710 = vpow2.f32 %v843_v31 }
 0x2f1   : > { %v710_v21 = vsel %vm571_vm4, %v1960_v20, 0.0  ;;  %v970_v30 = vpop.xlane.xlu0 %969  ;;  %1712 = vpow2.f32 %v841_v33 }
 0x2f2   : > { %711 = vadd.xlane.f32.xlu0 %v710_v21  ;;  %v974_v34 = vsub.f32 %v962_v60, %v970_v30  ;;  %v1709_v37 = vpop.eup %1708 }
 0x2f3   : > { %v973_v28 = vpop.xlane.xlu1 %972  ;;  %v713_v38 = vsel %vm571_vm4, %v1709_v37, 0.0 }
 0x2f4   : > { %v975_v32 = vsub.f32 %v965_v63, %v973_v28  ;;  %v976_v36 = vmul.f32 1.442695, %v974_v34  ;;  %v1695_v28 = vld [vmem:[%s1835_s19 + $0x8] sm:$0xff]  }
 0x2f5   : > { %1642 = vmatpush3.bf16.msra.mxu1 %v1695_v28 }
 0x2f6   : > { %v978_v35 = vmul.f32 1.442695, %v975_v32  ;;  %1655 = vmatprep.subr.bf16.mxu1 %v1750_v3 }
 0x2f8   : > { %1714 = vpow2.f32 %v978_v35 }
 0x2f9   : > { %1716 = vpow2.f32 %v976_v36 }
 0x2fa   : > { %v1711_v39 = vpop.eup %1710 }
 0x2fb   : > { %v1713_v40 = vpop.eup %1712  ;;  %v848_v41 = vsel %vm571_vm4, %v1711_v39, 0.0 }
 0x2fc   : > { %v845_v43 = vsel %vm571_vm4, %v1713_v40, 0.0 }
 0x2fd   : > { %721 = vrot.lane.b32.xlu1 %v1895_v15, %s1759_s23 }
 0x302   : > { %v1969_v42 = vpop.eup %1714 }
 0x303   : > { %v1717_v44 = vpop.eup %1716  ;;  %v983_v45 = vsel %vm571_vm4, %v1969_v42, 0.0 }
 0x304   : > { %v980_v46 = vsel %vm571_vm4, %v1717_v44, 0.0 }
 0x308   : > { %595 = vrot.lane.b32.xlu0 %v1895_v15, %s1760_s24 }
 0x321   : > { %714 = vadd.xlane.f32.xlu1 %v713_v38 }
 0x325   : > { %849 = vadd.xlane.f32.xlu1 %v848_v41 }
 0x327   : > { %846 = vadd.xlane.f32.xlu0 %v845_v43 }
 0x329   : > { %984 = vadd.xlane.f32.xlu1 %v983_v45  ;;  %v1529_v45 = vld [vmem:[%s1860_s12] ss:$0 sm:$0xff] }
 0x32b   : > { %981 = vadd.xlane.f32.xlu0 %v980_v46 }
 0x33a   : > { %856 = vrot.lane.b32.xlu1 %v1895_v15, %s1761_s26 }
 0x341   : > { %991 = vrot.lane.b32.xlu0 %v1895_v15, %s1762_s27 }
 0x377   : > { %v586_v47 = vpop.xlane.xlu0 %585 }
 0x378   : > { %1718 = vrcp.f32 %v586_v47 }
 0x379   : > { %v589_v48 = vpop.xlane.xlu1 %588 }
 0x37a   : > { %1720 = vrcp.f32 %v589_v48 }
 0x37d   : > { %v722_v56 = vpop.permute.xlu1 %721 }
 0x37f   : > { %v712_v49 = vpop.xlane.xlu0 %711 }
 0x380   : > { %1722 = vrcp.f32 %v712_v49 }
 0x382   : > { %v1719_v50 = vpop.eup %1718 }
 0x383   : > { %v596_v51 = vpop.permute.xlu0 %595  ;;  %v592_v53 = vmul.f32 %v1719_v50, %v1703_v16 }
 0x384   : > { %v1721_v52 = vpop.eup %1720  ;;  %1598 = vmatpush3.bf16.msra.mxu0 %v596_v51 }
 0x385   : > { %v593_v54 = vmul.f32 %v1721_v52, %v1705_v18  ;;  %1609 = vmatprep.subr.bf16.mxu0 %v1750_v3 }
 0x387   : > { %v594_v55 = vpack.c.bf16 %v593_v54, %v592_v53 }
 0x389   : > { %1600 = vmatmul.mubr.msk.bf16.vlgmr.msra.gmra.mrb[4].mxu0 %vm571_vm4, %v594_v55 }
 0x38a   : > { %1610 = vmatpush3.bf16.msra.mxu0 %v722_v56  ;;  %1611 = vmatprep.mubr.msk.bf16.mxu0 %vm1751_vm1, %v1750_v3  ;;  %v1723_v59 = vpop.eup %1722 }
 0x38b   : > { %1621 = vmatprep.subr.bf16.mxu0 %v1750_v3  ;;  %v718_v63 = vmul.f32 %v1723_v59, %v1960_v20 }
 0x3ae   : > { %v715_v15 = vpop.xlane.xlu1 %714 }
 0x3af   : > { %1724 = vrcp.f32 %v715_v15 }
 0x3b2   : > { %v850_v57 = vpop.xlane.xlu1 %849 }
 0x3b3   : > { %1726 = vrcp.f32 %v850_v57 }
 0x3b4   : > { %v847_v58 = vpop.xlane.xlu0 %846 }
 0x3b5   : > { %1728 = vrcp.f32 %v847_v58 }
 0x3b6   : > { %v985_v60 = vpop.xlane.xlu1 %984 }
 0x3b8   : > { %v982_v61 = vpop.xlane.xlu0 %981 }
 0x3b9   : > { %v1725_v62 = vpop.eup %1724  ;;  %1730 = vrcp.f32 %v982_v61 }
 0x3ba   : > { %v719_v0 = vmul.f32 %v1725_v62, %v1709_v37  ;;  %1732 = vrcp.f32 %v985_v60  ;;  %v857_v4 = vpop.permute.xlu1 %856 }
 0x3bc   : > { %v720_v1 = vpack.c.bf16 %v719_v0, %v718_v63  ;;  %v992_v12 = vpop.permute.xlu0 %991  ;;  %v1696_v63 = vld [vmem:[%s1840_s22] sm:$0xff]   ;;  %v1697_v0 = vld [vmem:[%s1840_s22 + $0x8] sm:$0xff]  }
 0x3bd   : > { %v1727_v2 = vpop.eup %1726 }
 0x3be   : > { %1612 = vmatmul.mubr.msk.bf16.vlgmr.msra.gmra.mrb[8].mxu0 %vm571_vm4, %v720_v1  ;;  %v854_v9 = vmul.f32 %v1727_v2, %v1711_v39  ;;  %v1698_v1 = vld [vmem:[%s1845_s25] sm:$0xff]   ;;  %v1699_v2 = vld [vmem:[%s1845_s25 + $0x8] sm:$0xff]  }
 0x3bf   : > { %v1729_v7 = vpop.eup %1728  ;;  %1622 = vmatpush3.bf16.msra.mxu0 %v857_v4  ;;  %1623 = vmatprep.mubr.msk.bf16.mxu0 %vm1751_vm1, %v1750_v3 }
 0x3c0   : > { %v853_v8 = vmul.f32 %v1729_v7, %v1713_v40  ;;  %1633 = vmatprep.subr.bf16.mxu0 %v1750_v3 }
 0x3c2   : > { %v855_v10 = vpack.c.bf16 %v854_v9, %v853_v8 }
 0x3c3   : > { %v1731_v11 = vpop.eup %1730 }
 0x3c4   : > { %v1733_v13 = vpop.eup %1732  ;;  %v988_v14 = vmul.f32 %v1731_v11, %v1717_v44 }
 0x3c5   : > { %v989_v16 = vmul.f32 %v1733_v13, %v1969_v42  ;;  %v1533_v13 = vld [vmem:[%s1860_s12 + $0x1] ss:$0 sm:$0xff] }
 0x3c6   : > { %1624 = vmatmul.mubr.msk.bf16.vlgmr.msra.gmra.mrb[12].mxu0 %vm571_vm4, %v855_v10 }
 0x3c7   : > { %1634 = vmatpush3.bf16.msra.mxu0 %v992_v12  ;;  %1635 = vmatprep.mubr.msk.bf16.mxu0 %vm1751_vm1, %v1750_v3  ;;  %v990_v17 = vpack.c.bf16 %v989_v16, %v988_v14 }
 0x3c8   : > { %1647 = vmatprep.subr.bf16.mxu0 %v1750_v3 }
 0x3ce   : > { %1636 = vmatmul.mubr.msk.bf16.vlgmr.msra.gmra.mrb[16].mxu0 %vm571_vm4, %v990_v17 }
 0x3cf   : > { %1651 = vmatprep.mubr.msk.bf16.mxu0 %vm1751_vm1, %v1750_v3  ;;  %1648 = vmatpush3.bf16.msra.mxu0 %v1696_v63  ;;  %v1546_v63 = vld [vmem:[%s1860_s12 + $0x5] ss:$0 sm:$0xff] }
 0x3d0   : > { %1649 = vmatprep.subr.bf16.mxu0 %v1750_v3 }
 0x3d3   : > { %1650 = vmatpush3.bf16.msra.mxu0 %v1697_v0 }
 0x45c   : > { %v635_v18 = vpop.f32.mrb[4].mxu0 }
 0x45d   : > { %642 = vst.msk [vmem:[#allocation3] sm:$0xff] %vm523_vm3, %v635_v18  ;;  %v1601_v19 = vpop.f32.mrb[5].mxu0 }
 0x45e   : > { %v638_v20 = vpop.f32.mrb[6].mxu0  ;;  %v1534_v19 = vld [vmem:[%s1860_s12 + $0x2] ss:$0 sm:$0xff] }
 0x45f   : > { %643 = vst.msk [vmem:[#allocation3 + $0x8] sm:$0xff] %vm523_vm3, %v638_v20  ;;  %v1602_v21 = vpop.f32.mrb[7].mxu0 }
 0x491   : > { %v761_v22 = vpop.f32.mrb[8].mxu0 }
 0x492   : > { %770 = vrot.lane.b32.xlu1 %v761_v22, %s1763_s2  ;;  %v1613_v23 = vpop.f32.mrb[9].mxu0 }
 0x493   : > { %v764_v24 = vpop.f32.mrb[10].mxu0 }
 0x494   : > { %772 = vrot.lane.b32.xlu0 %v764_v24, %s1763_s2  ;;  %v1614_v25 = vpop.f32.mrb[11].mxu0  ;;  %v1700_v24 = vld [vmem:[%s1845_s25 + $0x10] sm:$0xff]  }
 0x495   : > { %v1701_v25 = vld [vmem:[%s1845_s25 + $0x18] sm:$0xff]  }
 0x499   : > { %v896_v27 = vpop.f32.mrb[12].mxu0 }
 0x49a   : > { %905 = vrot.lane.b32.xlu1 %v896_v27, %s1764_s3  ;;  %v1625_v29 = vpop.f32.mrb[13].mxu0 }
 0x49b   : > { %v899_v30 = vpop.f32.mrb[14].mxu0 }
 0x49c   : > { %907 = vrot.lane.b32.xlu0 %v899_v30, %s1764_s3  ;;  %v1626_v31 = vpop.f32.mrb[15].mxu0 }
 0x4a1   : > { %v1031_v32 = vpop.f32.mrb[16].mxu0 }
 0x4a2   : > { %1040 = vrot.lane.b32.xlu1 %v1031_v32, %s1765_s10  ;;  %v1637_v33 = vpop.f32.mrb[17].mxu0 }
 0x4a3   : > { %v1034_v34 = vpop.f32.mrb[18].mxu0 }
 0x4a4   : > { %1042 = vrot.lane.b32.xlu0 %v1034_v34, %s1765_s10  ;;  %v1638_v35 = vpop.f32.mrb[19].mxu0 }
 0x504   : > { %v771_v36 = vpop.permute.xlu1 %770 }
 0x505   : > { %777 = vst.msk [vmem:[#allocation3] sm:$0xff] %vm776_vm5, %v771_v36  ;;  %v1539_v36 = vld [vmem:[%s1860_s12 + $0x3] ss:$0 sm:$0xff] }
 0x506   : > { %v773_v37 = vpop.permute.xlu0 %772 }
 0x507   : > { %778 = vst.msk [vmem:[#allocation3 + $0x8] sm:$0xff] %vm776_vm5, %v773_v37 }
 0x50c   : > { %v906_v38 = vpop.permute.xlu1 %905 }
 0x50d   : > { %912 = vst.msk [vmem:[#allocation3] sm:$0xff] %vm911_vm6, %v906_v38 }
 0x50e   : > { %v908_v39 = vpop.permute.xlu0 %907 }
 0x50f   : > { %913 = vst.msk [vmem:[#allocation3 + $0x8] sm:$0xff] %vm911_vm6, %v908_v39 }
 0x514   : > { %v1041_v40 = vpop.permute.xlu1 %1040 }
 0x515   : > { %1047 = vst.msk [vmem:[#allocation3] sm:$0xff] %vm1046_vm7, %v1041_v40 }
 0x516   : > { %v1043_v41 = vpop.permute.xlu0 %1042 }
 0x517   : > { %1048 = vst.msk [vmem:[#allocation3 + $0x8] sm:$0xff] %vm1046_vm7, %v1043_v41 }
 0x51c   : > { %v1049_v42 = vld [vmem:[#allocation3] sm:$0xff] }
 0x51e   : > { %v1050_v43 = vld [vmem:[#allocation3 + $0x8] sm:$0xff] }
 0x51f   : > { %v1055_v44 = vpack.c.bf16 %v1050_v43, %v1049_v42 }
 0x521   : > { %1644 = vmatmul.mubr.msk.bf16.vlgmr.msra.gmra.mrb[16].mxu1 %vm472_vm2, %v1055_v44 }
 0x522   : > { %1663 = vmatprep.mubr.msk.bf16.mxu1 %vm1751_vm1, %v1750_v3  ;;  %1656 = vmatpush3.bf16.msra.mxu1 %v1698_v1 }
 0x523   : > { %1657 = vmatprep.subr.bf16.mxu1 %v1750_v3 }
 0x526   : > { %1658 = vmatpush3.bf16.msra.mxu1 %v1699_v2 }
 0x527   : > { %1659 = vmatprep.subr.bf16.mxu1 %v1750_v3 }
 0x52a   : > { %1660 = vmatpush3.bf16.msra.mxu1 %v1700_v24 }
 0x52b   : > { %1661 = vmatprep.subr.bf16.mxu1 %v1750_v3 }
 0x52e   : > { %1662 = vmatpush3.bf16.msra.mxu1 %v1701_v25 }
 0x5f4   : > { %v1110_v46 = vpop.f32.mrb[16].mxu1 }
 0x5f5   : > { %v1111_v47 = vadd.f32 %v1529_v45, %v1110_v46  ;;  %v1645_v48 = vpop.f32.mrb[17].mxu1 }
 0x5f6   : > { %v1113_v49 = vpop.f32.mrb[18].mxu1 }
 0x5f7   : > { %v1114_v50 = vadd.f32 %v1529_v45, %v1113_v49  ;;  %v1646_v51 = vpop.f32.mrb[19].mxu1  ;;  %v1117_v52 = vadd.f32 %v1111_v47, %v1877_v5 }
 0x5f9   : > { %v1121_v53 = vsel %vm472_vm2, %v1117_v52, 0.0  ;;  %v1118_v54 = vadd.f32 %v1114_v50, %v1879_v6 }
 0x5fa   : > { %1122 = vadd.xlane.f32.xlu1 %v1121_v53 }
 0x5fb   : > { %v1124_v55 = vsel %vm472_vm2, %v1118_v54, 0.0 }
 0x5fc   : > { %1125 = vadd.xlane.f32.xlu0 %v1124_v55 }
 0x687   : > { %v1123_v56 = vpop.xlane.xlu1 %1122 }
 0x688   : > { %v1128_v15 = vmul.f32 0.03125, %v1123_v56 }
 0x689   : > { %v1126_v57 = vpop.xlane.xlu0 %1125 }
 0x68a   : > { %v1130_v58 = vsub.f32 %v1117_v52, %v1128_v15  ;;  %v1129_v59 = vmul.f32 0.03125, %v1126_v57 }
 0x68c   : > { %v1131_v60 = vsub.f32 %v1118_v54, %v1129_v59  ;;  %v1132_v61 = vmul.f32 %v1130_v58, %v1130_v58 }
 0x68e   : > { %v1134_v5 = vsel %vm472_vm2, %v1132_v61, 0.0  ;;  %v1133_v62 = vmul.f32 %v1131_v60, %v1131_v60 }
 0x68f   : > { %1135 = vadd.xlane.f32.xlu0 %v1134_v5  ;;  %v1545_v5 = vld [vmem:[%s1860_s12 + $0x4] ss:$0 sm:$0xff] }
 0x690   : > { %v1137_v6 = vsel %vm472_vm2, %v1133_v62, 0.0 }
 0x691   : > { %1138 = vadd.xlane.f32.xlu1 %v1137_v6 }
 0x71c   : > { %v1136_v4 = vpop.xlane.xlu0 %1135 }
 0x71d   : > { %v1140_v7 = vmul.f32 0.03125, %v1136_v4 }
 0x71e   : > { %v1139_v8 = vpop.xlane.xlu1 %1138 }
 0x71f   : > { %v1142_v9 = vadd.f32 1e-05, %v1140_v7  ;;  %v1141_v10 = vmul.f32 0.03125, %v1139_v8 }
 0x721   : > { %1734 = vrsqrt.f32 %v1142_v9  ;;  %v1143_v11 = vadd.f32 1e-05, %v1141_v10 }
 0x723   : > { %1736 = vrsqrt.f32 %v1143_v11 }
 0x72b   : > { %v1735_v12 = vpop.eup %1734 }
 0x72c   : > { %v1146_v14 = vmul.f32 %v1735_v12, %v1130_v58 }
 0x72d   : > { %v1737_v16 = vpop.eup %1736 }
 0x72e   : > { %v1152_v17 = vmul.f32 %v1533_v13, %v1146_v14  ;;  %v1147_v18 = vmul.f32 %v1737_v16, %v1131_v60 }
 0x730   : > { %v1153_v20 = vmul.f32 %v1533_v13, %v1147_v18  ;;  %v1158_v21 = vadd.f32 %v1534_v19, %v1152_v17 }
 0x732   : > { %v1159_v22 = vadd.f32 %v1534_v19, %v1153_v20 }
 0x734   : > { %v1164_v23 = vpack.c.bf16 %v1159_v22, %v1158_v21 }
 0x736   : > { %1652 = vmatmul.mubr.msk.bf16.vlgmr.msra.gmra.mrb[20].mxu0 %vm472_vm2, %v1164_v23 }
 0x809   : > { %v1221_v27 = vpop.f32.mrb[20].mxu0 }
 0x80a   : > { %v1222_v28 = vadd.f32 %v1535_v26, %v1221_v27  ;;  %v1653_v29 = vpop.f32.mrb[21].mxu0 }
 0x80b   : > { %v1224_v30 = vpop.f32.mrb[22].mxu0 }
 0x80c   : > { %v1225_v31 = vadd.f32 %v1535_v26, %v1224_v30  ;;  %v1654_v32 = vpop.f32.mrb[23].mxu0  ;;  %v1228_v33 = vmax.f32 %v1222_v28, 0.0 }
 0x80e   : > { %v1229_v34 = vmax.f32 %v1225_v31, 0.0 }
 0x810   : > { %v1238_v35 = vpack.c.bf16 %v1229_v34, %v1228_v33 }
 0x812   : > { %1664 = vmatmul.mubr.msk.bf16.vlgmr.msra.gmra.mrb[20].mxu1 %vm1268_vm8, %v1238_v35 }
 0x8e5   : > { %v1306_v3 = vpop.f32.mrb[20].mxu1 }
 0x8e6   : > { %v1307_v37 = vadd.f32 %v1539_v36, %v1306_v3  ;;  %v1665_v38 = vpop.f32.mrb[21].mxu1 }
 0x8e7   : > { %v1309_v39 = vpop.f32.mrb[22].mxu1 }
 0x8e8   : > { %v1310_v40 = vadd.f32 %v1539_v36, %v1309_v39  ;;  %v1666_v41 = vpop.f32.mrb[23].mxu1  ;;  %v1313_v42 = vadd.f32 %v1307_v37, %v1158_v21 }
 0x8ea   : > { %v1317_v43 = vsel %vm472_vm2, %v1313_v42, 0.0  ;;  %v1314_v44 = vadd.f32 %v1310_v40, %v1159_v22 }
 0x8eb   : > { %1318 = vadd.xlane.f32.xlu0 %v1317_v43 }
 0x8ec   : > { %v1320_v45 = vsel %vm472_vm2, %v1314_v44, 0.0 }
 0x8ed   : > { %1321 = vadd.xlane.f32.xlu1 %v1320_v45 }
 0x978   : > { %v1319_v46 = vpop.xlane.xlu0 %1318 }
 0x979   : > { %v1323_v47 = vmul.f32 0.03125, %v1319_v46 }
 0x97a   : > { %v1322_v48 = vpop.xlane.xlu1 %1321 }
 0x97b   : > { %v1325_v49 = vsub.f32 %v1313_v42, %v1323_v47  ;;  %v1324_v50 = vmul.f32 0.03125, %v1322_v48 }
 0x97d   : > { %v1326_v51 = vsub.f32 %v1314_v44, %v1324_v50  ;;  %v1327_v52 = vmul.f32 %v1325_v49, %v1325_v49 }
 0x97f   : > { %v1329_v53 = vsel %vm472_vm2, %v1327_v52, 0.0  ;;  %v1328_v54 = vmul.f32 %v1326_v51, %v1326_v51 }
 0x980   : > { %1330 = vadd.xlane.f32.xlu0 %v1329_v53 }
 0x981   : > { %v1332_v55 = vsel %vm472_vm2, %v1328_v54, 0.0 }
 0x982   : > { %1333 = vadd.xlane.f32.xlu1 %v1332_v55 }
 0xa0d   : > { %v1331_v56 = vpop.xlane.xlu0 %1330 }
 0xa0e   : > { %v1335_v15 = vmul.f32 0.03125, %v1331_v56 }
 0xa0f   : > { %v1334_v57 = vpop.xlane.xlu1 %1333 }
 0xa10   : > { %v1337_v58 = vadd.f32 1e-05, %v1335_v15  ;;  %v1336_v59 = vmul.f32 0.03125, %v1334_v57 }
 0xa12   : > { %1738 = vrsqrt.f32 %v1337_v58  ;;  %v1338_v60 = vadd.f32 1e-05, %v1336_v59 }
 0xa14   : > { %1740 = vrsqrt.f32 %v1338_v60 }
 0xa1c   : > { %v1739_v61 = vpop.eup %1738 }
 0xa1d   : > { %v1341_v62 = vmul.f32 %v1739_v61, %v1325_v49 }
 0xa1e   : > { %v1741_v6 = vpop.eup %1740 }
 0xa1f   : > { %v1347_v0 = vmul.f32 %v1545_v5, %v1341_v62  ;;  %v1342_v1 = vmul.f32 %v1741_v6, %v1326_v51 }
 0xa21   : > { %v1353_v2 = vadd.f32 %v1546_v63, %v1347_v0  ;;  %v1348_v4 = vmul.f32 %v1545_v5, %v1342_v1 }
 0xa23   : > { %1360 = vrot.lane.b32.xlu0 %v1353_v2, %s1766_s11  ;;  %1355 = vst.msk [vmem:[#allocation2] sm:$0xff] %vm472_vm2, %v1353_v2  ;;  %v1354_v7 = vadd.f32 %v1546_v63, %v1348_v4 }
 0xa24   : > { %1358 = vst.msk [vmem:[%s1865_s13] sm:$0xf] %vm1357_vm9, %v1353_v2 }
 0xa25   : > { %1366 = vrot.lane.b32.xlu1 %v1354_v7, %s1760_s24  ;;  %1356 = vst.msk [vmem:[#allocation2 + $0x8] sm:$0xff] %vm472_vm2, %v1354_v7 }
 0xa29   : > { %1371 = vrot.lane.b32.xlu1 %v1354_v7, %s1753_s16 }
 0xa95   : > { %v1361_v8 = vpop.permute.xlu0 %1360 }
 0xa96   : > { %1364 = vst.msk [vmem:[%s1865_s13 - $0x4] sm:$0xf0] %vm1363_vm10, %v1361_v8 }
 0xa97   : > { %v1367_v9 = vpop.permute.xlu1 %1366 }
 0xa98   : > { %1370 = vst.msk [vmem:[%s1865_s13] sm:$0xf] %vm1369_vm11, %v1367_v9 }
 0xa9b   : > { %v1372_v10 = vpop.permute.xlu1 %1371 }
 0xa9c   : > { %1375 = vst.msk [vmem:[%s1865_s13 - $0x4] sm:$0xf0] %vm1374_vm12, %v1372_v10 }
 0xa9d PF: > { %s19_s30 = sadd.s32 1, %s1748_s30  }
 0xa9e   : > { %p16_p5 = scmp.ge.s32.totalorder %s19_s30, 4  }
 0xaa0   :  { %18 = sbr.rel (!%p16_p5) target bundleno = 3 (0x3), region = 111 }

</bundles_post_ra>
